<compile_context>
chip_gen: v7x
topology: tpu7x:2x2x1
jax: 0.10.0
libtpu: 0.0.40
codegen_flags: <defaults>
</compile_context>

<pallas_src>
import functools

import jax
import jax.numpy as jnp
from jax.experimental import pallas as pl
from jax.experimental.pallas import tpu as pltpu

# Layer dims, matching the PyTorch module (encoder then decoder):
LAYER_DIMS = [
    (64, 128), (128, 96), (96, 64), (64, 48), (48, 32),    # encoder
    (32, 48), (48, 64), (64, 96), (96, 128), (128, 64),    # decoder
]
N_LAYERS = len(LAYER_DIMS)
LANE = 128
# Padded K dim per layer: layer 0 consumes the raw 64-wide input, all later layers
# consume a 128-lane-padded activation.
IN_PADS = [LAYER_DIMS[0][0]] + [LANE] * (N_LAYERS - 1)
W_ROWS = sum(IN_PADS)                                       # 1216 (multiple of 8)


def _round_up(x, m):
    return ((x + m - 1) // m) * m


def autoencoder_kernel(x_ref, w_ref, b_ref, out_ref):
    """x_ref: (tb, 64) f32. w_ref: (1216, 128) f32|bf16 (all layers stacked along rows).
    b_ref: (10, 128) f32. out_ref: (tb, 128) f32 packed slab
    (enc in lanes 0..31, dec in lanes 64..127)."""
    cdt = jnp.dtype(w_ref.dtype)                   # MXU-input / tanh compute dtype

    h = x_ref[...]                                 # (tb, 64) f32
    enc = None
    off = 0
    for i in range(N_LAYERS):
        k = IN_PADS[i]
        w = w_ref[off:off + k, :]                  # static, sublane-aligned slice
        off += k
        # MXU matmul, f32 accumulate (works for f32 or bf16 weights).
        h = jnp.dot(h.astype(cdt), w, preferred_element_type=jnp.float32)
        h = h + b_ref[i:i + 1, :]                  # (tb, 128); padded lanes stay 0
        if i == 4:
            enc = h                                # encoder output (no tanh), lanes 0..31
        elif i != N_LAYERS - 1:                    # no tanh on final decoder layer
            h = jnp.tanh(h.astype(cdt))            # bf16 tanh on the fast EUP path when cdt=bf16

    # Pack both results into one lane-dense slab:
    #   enc has zeros in lanes 32..127, rolled dec has zeros in lanes 0..63.
    out_ref[...] = enc + pltpu.roll(h.astype(jnp.float32), shift=64, axis=1)


def prepare_params(weights, biases, dtype=jnp.float32):
    """One-time relayout (keep the results around between calls).

    weights[i]: (out, in) PyTorch convention; biases[i]: (out,).
    Returns:
      w_all: (1216, 128) -- per-layer (in_pad, 128) zero-padded weights, stacked on rows.
      b_all: (10, 128) f32 -- zero-padded biases.
    dtype=jnp.bfloat16 halves weight VMEM/DMA and uses the bf16 MXU/EUP path on
    v6e/v7x (accumulation stays f32 in-kernel); keep f32 for bit-tight numerics.
    """
    w_blocks, b_rows = [], []
    for i, ((din, dout), w, b) in enumerate(zip(LAYER_DIMS, weights, biases)):
        in_pad = IN_PADS[i]
        wp = jnp.zeros((in_pad, LANE), dtype).at[:din, :dout].set(w.T.astype(dtype))
        bp = jnp.zeros((LANE,), jnp.float32).at[:dout].set(b.astype(jnp.float32))
        w_blocks.append(wp)
        b_rows.append(bp)
    w_all = jnp.concatenate(w_blocks, axis=0)       # (1216, 128)
    b_all = jnp.stack(b_rows, axis=0)               # (10, 128)
    return w_all, b_all


@functools.partial(jax.jit, static_argnames=("tb",))
def autoencoder_forward(x, w_all, b_all, *, tb=2048):
    """x: (B, 64) float32. w_all/b_all: output of prepare_params().
    Returns (encoded (B, 32), decoded (B, 64))."""
    B, D_in = x.shape
    assert D_in == 64

    # Batch tiling:
    #  * clamp the tile for tiny batches,
    #  * cap it at ~B/2 so the parallel grid keeps >= 2 steps (both v7x TCs busy),
    #  * zero-pad ragged batches.
    half = _round_up(-(-B // 2), 8)
    tb_eff = max(8, min(tb, half))
    B_pad = _round_up(B, tb_eff)
    if B_pad != B:
        x = jnp.pad(x, ((0, B_pad - B), (0, 0)))

    grid = (B_pad // tb_eff,)

    x_spec = pl.BlockSpec((tb_eff, 64), lambda i: (i, 0))
    w_spec = pl.BlockSpec((W_ROWS, LANE), lambda i: (0, 0))        # constant block
    b_spec = pl.BlockSpec((N_LAYERS, LANE), lambda i: (0, 0))      # constant block
    out_spec = pl.BlockSpec((tb_eff, LANE), lambda i: (i, 0))

    out_shape = jax.ShapeDtypeStruct((B_pad, LANE), jnp.float32)   # packed enc|dec slab

    w_bytes = w_all.size * w_all.dtype.itemsize
    b_bytes = b_all.size * b_all.dtype.itemsize
    cost = pl.CostEstimate(
        flops=2 * B_pad * sum(k * LANE for k in IN_PADS),
        transcendentals=B_pad * 8 * LANE,                          # 8 tanh'd layers, padded
        bytes_accessed=x.size * x.dtype.itemsize + B_pad * LANE * 4 + w_bytes + b_bytes,
    )

    slab = pl.pallas_call(
        autoencoder_kernel,
        out_shape=out_shape,
        grid_spec=pltpu.PrefetchScalarGridSpec(
            num_scalar_prefetch=0,
            grid=grid,
            in_specs=[x_spec, w_spec, b_spec],
            out_specs=out_spec,
        ),
        compiler_params=pltpu.CompilerParams(
            dimension_semantics=("parallel",),
            vmem_limit_bytes=32 * 1024 * 1024,     # headroom over v5e's 16 MiB default
        ),
        cost_estimate=cost,
    )(x, w_all, b_all)

    return slab[:B, :32], slab[:B, 64:128]


def init_params(key):
    """Deterministic PyTorch-like init: U(-1/sqrt(fan_in), 1/sqrt(fan_in))."""
    weights, biases = [], []
    for (din, dout) in LAYER_DIMS:
        key, kw, kb = jax.random.split(key, 3)
        bound = 1.0 / jnp.sqrt(float(din))
        w = jax.random.uniform(kw, (dout, din), jnp.float32, -bound, bound)  # (out, in)
        b = jax.random.uniform(kb, (dout,), jnp.float32, -bound, bound)
        weights.append(w)
        biases.append(b)
    return weights, biases


def reference_forward(x, weights, biases):
    h = x
    for i in range(5):
        h = h @ weights[i].T + biases[i]
        if i < 4:
            h = jnp.tanh(h)
    enc = h
    for i in range(5, 10):
        h = h @ weights[i].T + biases[i]
        if i < 9:
            h = jnp.tanh(h)
    return enc, h


if __name__ == "__main__":
    key = jax.random.PRNGKey(0)
    key, kx, kx2 = jax.random.split(key, 3)

    weights, biases = init_params(key)
    w_all, b_all = prepare_params(weights, biases)        # one-time relayout, outside jit

    # Main case: small batch, grid of 2 parallel steps (both v7x TCs get work).
    B = 64
    x = jax.random.normal(kx, (B, 64), jnp.float32)
    enc, dec = autoencoder_forward(x, w_all, b_all)
    enc = jax.block_until_ready(enc)
    dec = jax.block_until_ready(dec)

    enc_ref, dec_ref = reference_forward(x, weights, biases)
    assert enc.shape == (B, 32) and dec.shape == (B, 64)
    assert jnp.allclose(enc, enc_ref, atol=1e-5, rtol=1e-5)
    assert jnp.allclose(dec, dec_ref, atol=1e-5, rtol=1e-5)

    # Ragged small batch exercises the zero-pad path (no B % tb assumption).
    B2 = 10
    x2 = jax.random.normal(kx2, (B2, 64), jnp.float32)
    enc2, dec2 = autoencoder_forward(x2, w_all, b_all)
    enc2 = jax.block_until_ready(enc2)
    dec2 = jax.block_until_ready(dec2)
    enc2_ref, dec2_ref = reference_forward(x2, weights, biases)
    assert enc2.shape == (B2, 32) and dec2.shape == (B2, 64)
    assert jnp.allclose(enc2, enc2_ref, atol=1e-5, rtol=1e-5)
    assert jnp.allclose(dec2, dec2_ref, atol=1e-5, rtol=1e-5)

    # bf16 weight/activation path (fast MXU + bf16 EUP on v6e/v7x), loose tolerance.
    w_bf, b_bf = prepare_params(weights, biases, dtype=jnp.bfloat16)
    enc3, dec3 = autoencoder_forward(x, w_bf, b_bf)
    enc3 = jax.block_until_ready(enc3)
    dec3 = jax.block_until_ready(dec3)
    assert enc3.shape == (B, 32) and dec3.shape == (B, 64)
    assert jnp.allclose(enc3, enc_ref, atol=8e-2, rtol=5e-2)
    assert jnp.allclose(dec3, dec_ref, atol=8e-2, rtol=5e-2)

    print("KERNEL_OK")
</pallas_src>

<mosaic_0001>
module attributes {stable_mosaic.version = 11 : i64} {
  func.func @autoencoder_kernel(%arg0: i32, %arg1: memref<32x64xf32, #tpu.memory_space<vmem>>, %arg2: memref<1216x128xf32, #tpu.memory_space<vmem>>, %arg3: memref<10x128xf32, #tpu.memory_space<vmem>>, %arg4: memref<32x128xf32, #tpu.memory_space<vmem>>) attributes {dimension_semantics = [#tpu.dimension_semantics<parallel>], iteration_bounds = array<i64: 2>, scalar_prefetch = 0 : i64, scratch_operands = 0 : i64, tpu.core_type = #tpu.core_type<tc>, window_params = [{transform_indices = @transform_0, window_bounds = array<i64: 32, 64>}, {pipeline_mode = #tpu.pipeline_mode<synchronous>, transform_indices = @transform_1, window_bounds = array<i64: 1216, 128>}, {pipeline_mode = #tpu.pipeline_mode<synchronous>, transform_indices = @transform_2, window_bounds = array<i64: 10, 128>}, {transform_indices = @transform_3, window_bounds = array<i64: 32, 128>}]} {
    %c0 = arith.constant 0 : index
    %c0_0 = arith.constant 0 : index
    %0 = vector.load %arg1[%c0, %c0_0] : memref<32x64xf32, #tpu.memory_space<vmem>>, vector<32x64xf32>
    %c0_1 = arith.constant 0 : index
    %c0_2 = arith.constant 0 : index
    %1 = vector.load %arg2[%c0_1, %c0_2] : memref<1216x128xf32, #tpu.memory_space<vmem>>, vector<64x128xf32>
    %cst = arith.constant dense<0.000000e+00> : vector<32x128xf32>
    %2 = tpu.matmul %0, %1, %cst {dimension_numbers = #tpu.dot_dimension_numbers<[1], [0], [0], [1], [0, 0, 1, 1], [], []>} : vector<32x64xf32>, vector<64x128xf32>, vector<32x128xf32> -> vector<32x128xf32>
    %c0_3 = arith.constant 0 : index
    %c0_4 = arith.constant 0 : index
    %3 = vector.load %arg3[%c0_3, %c0_4] : memref<10x128xf32, #tpu.memory_space<vmem>>, vector<1x128xf32>
    %4 = vector.broadcast %3 : vector<1x128xf32> to vector<32x128xf32>
    %5 = arith.addf %2, %4 : vector<32x128xf32>
    %6 = math.tanh %5 : vector<32x128xf32>
    %c64 = arith.constant 64 : index
    %c0_5 = arith.constant 0 : index
    %7 = vector.load %arg2[%c64, %c0_5] : memref<1216x128xf32, #tpu.memory_space<vmem>>, vector<128x128xf32>
    %cst_6 = arith.constant dense<0.000000e+00> : vector<32x128xf32>
    %8 = tpu.matmul %6, %7, %cst_6 {dimension_numbers = #tpu.dot_dimension_numbers<[1], [0], [0], [1], [0, 0, 1, 1], [], []>} : vector<32x128xf32>, vector<128x128xf32>, vector<32x128xf32> -> vector<32x128xf32>
    %c1 = arith.constant 1 : index
    %c0_7 = arith.constant 0 : index
    %9 = vector.load %arg3[%c1, %c0_7] : memref<10x128xf32, #tpu.memory_space<vmem>>, vector<1x128xf32>
    %10 = vector.broadcast %9 : vector<1x128xf32> to vector<32x128xf32>
    %11 = arith.addf %8, %10 : vector<32x128xf32>
    %12 = math.tanh %11 : vector<32x128xf32>
    %c192 = arith.constant 192 : index
    %c0_8 = arith.constant 0 : index
    %13 = vector.load %arg2[%c192, %c0_8] : memref<1216x128xf32, #tpu.memory_space<vmem>>, vector<128x128xf32>
    %cst_9 = arith.constant dense<0.000000e+00> : vector<32x128xf32>
    %14 = tpu.matmul %12, %13, %cst_9 {dimension_numbers = #tpu.dot_dimension_numbers<[1], [0], [0], [1], [0, 0, 1, 1], [], []>} : vector<32x128xf32>, vector<128x128xf32>, vector<32x128xf32> -> vector<32x128xf32>
    %c2 = arith.constant 2 : index
    %c0_10 = arith.constant 0 : index
    %15 = vector.load %arg3[%c2, %c0_10] : memref<10x128xf32, #tpu.memory_space<vmem>>, vector<1x128xf32>
    %16 = vector.broadcast %15 : vector<1x128xf32> to vector<32x128xf32>
    %17 = arith.addf %14, %16 : vector<32x128xf32>
    %18 = math.tanh %17 : vector<32x128xf32>
    %c320 = arith.constant 320 : index
    %c0_11 = arith.constant 0 : index
    %19 = vector.load %arg2[%c320, %c0_11] : memref<1216x128xf32, #tpu.memory_space<vmem>>, vector<128x128xf32>
    %cst_12 = arith.constant dense<0.000000e+00> : vector<32x128xf32>
    %20 = tpu.matmul %18, %19, %cst_12 {dimension_numbers = #tpu.dot_dimension_numbers<[1], [0], [0], [1], [0, 0, 1, 1], [], []>} : vector<32x128xf32>, vector<128x128xf32>, vector<32x128xf32> -> vector<32x128xf32>
    %c3 = arith.constant 3 : index
    %c0_13 = arith.constant 0 : index
    %21 = vector.load %arg3[%c3, %c0_13] : memref<10x128xf32, #tpu.memory_space<vmem>>, vector<1x128xf32>
    %22 = vector.broadcast %21 : vector<1x128xf32> to vector<32x128xf32>
    %23 = arith.addf %20, %22 : vector<32x128xf32>
    %24 = math.tanh %23 : vector<32x128xf32>
    %c448 = arith.constant 448 : index
    %c0_14 = arith.constant 0 : index
    %25 = vector.load %arg2[%c448, %c0_14] : memref<1216x128xf32, #tpu.memory_space<vmem>>, vector<128x128xf32>
    %cst_15 = arith.constant dense<0.000000e+00> : vector<32x128xf32>
    %26 = tpu.matmul %24, %25, %cst_15 {dimension_numbers = #tpu.dot_dimension_numbers<[1], [0], [0], [1], [0, 0, 1, 1], [], []>} : vector<32x128xf32>, vector<128x128xf32>, vector<32x128xf32> -> vector<32x128xf32>
    %c4 = arith.constant 4 : index
    %c0_16 = arith.constant 0 : index
    %27 = vector.load %arg3[%c4, %c0_16] : memref<10x128xf32, #tpu.memory_space<vmem>>, vector<1x128xf32>
    %28 = vector.broadcast %27 : vector<1x128xf32> to vector<32x128xf32>
    %29 = arith.addf %26, %28 : vector<32x128xf32>
    %c576 = arith.constant 576 : index
    %c0_17 = arith.constant 0 : index
    %30 = vector.load %arg2[%c576, %c0_17] : memref<1216x128xf32, #tpu.memory_space<vmem>>, vector<128x128xf32>
    %cst_18 = arith.constant dense<0.000000e+00> : vector<32x128xf32>
    %31 = tpu.matmul %29, %30, %cst_18 {dimension_numbers = #tpu.dot_dimension_numbers<[1], [0], [0], [1], [0, 0, 1, 1], [], []>} : vector<32x128xf32>, vector<128x128xf32>, vector<32x128xf32> -> vector<32x128xf32>
    %c5 = arith.constant 5 : index
    %c0_19 = arith.constant 0 : index
    %32 = vector.load %arg3[%c5, %c0_19] : memref<10x128xf32, #tpu.memory_space<vmem>>, vector<1x128xf32>
    %33 = vector.broadcast %32 : vector<1x128xf32> to vector<32x128xf32>
    %34 = arith.addf %31, %33 : vector<32x128xf32>
    %35 = math.tanh %34 : vector<32x128xf32>
    %c704 = arith.constant 704 : index
    %c0_20 = arith.constant 0 : index
    %36 = vector.load %arg2[%c704, %c0_20] : memref<1216x128xf32, #tpu.memory_space<vmem>>, vector<128x128xf32>
    %cst_21 = arith.constant dense<0.000000e+00> : vector<32x128xf32>
    %37 = tpu.matmul %35, %36, %cst_21 {dimension_numbers = #tpu.dot_dimension_numbers<[1], [0], [0], [1], [0, 0, 1, 1], [], []>} : vector<32x128xf32>, vector<128x128xf32>, vector<32x128xf32> -> vector<32x128xf32>
    %c6 = arith.constant 6 : index
    %c0_22 = arith.constant 0 : index
    %38 = vector.load %arg3[%c6, %c0_22] : memref<10x128xf32, #tpu.memory_space<vmem>>, vector<1x128xf32>
    %39 = vector.broadcast %38 : vector<1x128xf32> to vector<32x128xf32>
    %40 = arith.addf %37, %39 : vector<32x128xf32>
    %41 = math.tanh %40 : vector<32x128xf32>
    %c832 = arith.constant 832 : index
    %c0_23 = arith.constant 0 : index
    %42 = vector.load %arg2[%c832, %c0_23] : memref<1216x128xf32, #tpu.memory_space<vmem>>, vector<128x128xf32>
    %cst_24 = arith.constant dense<0.000000e+00> : vector<32x128xf32>
    %43 = tpu.matmul %41, %42, %cst_24 {dimension_numbers = #tpu.dot_dimension_numbers<[1], [0], [0], [1], [0, 0, 1, 1], [], []>} : vector<32x128xf32>, vector<128x128xf32>, vector<32x128xf32> -> vector<32x128xf32>
    %c7 = arith.constant 7 : index
    %c0_25 = arith.constant 0 : index
    %44 = vector.load %arg3[%c7, %c0_25] : memref<10x128xf32, #tpu.memory_space<vmem>>, vector<1x128xf32>
    %45 = vector.broadcast %44 : vector<1x128xf32> to vector<32x128xf32>
    %46 = arith.addf %43, %45 : vector<32x128xf32>
    %47 = math.tanh %46 : vector<32x128xf32>
    %c960 = arith.constant 960 : index
    %c0_26 = arith.constant 0 : index
    %48 = vector.load %arg2[%c960, %c0_26] : memref<1216x128xf32, #tpu.memory_space<vmem>>, vector<128x128xf32>
    %cst_27 = arith.constant dense<0.000000e+00> : vector<32x128xf32>
    %49 = tpu.matmul %47, %48, %cst_27 {dimension_numbers = #tpu.dot_dimension_numbers<[1], [0], [0], [1], [0, 0, 1, 1], [], []>} : vector<32x128xf32>, vector<128x128xf32>, vector<32x128xf32> -> vector<32x128xf32>
    %c8 = arith.constant 8 : index
    %c0_28 = arith.constant 0 : index
    %50 = vector.load %arg3[%c8, %c0_28] : memref<10x128xf32, #tpu.memory_space<vmem>>, vector<1x128xf32>
    %51 = vector.broadcast %50 : vector<1x128xf32> to vector<32x128xf32>
    %52 = arith.addf %49, %51 : vector<32x128xf32>
    %53 = math.tanh %52 : vector<32x128xf32>
    %c1088 = arith.constant 1088 : index
    %c0_29 = arith.constant 0 : index
    %54 = vector.load %arg2[%c1088, %c0_29] : memref<1216x128xf32, #tpu.memory_space<vmem>>, vector<128x128xf32>
    %cst_30 = arith.constant dense<0.000000e+00> : vector<32x128xf32>
    %55 = tpu.matmul %53, %54, %cst_30 {dimension_numbers = #tpu.dot_dimension_numbers<[1], [0], [0], [1], [0, 0, 1, 1], [], []>} : vector<32x128xf32>, vector<128x128xf32>, vector<32x128xf32> -> vector<32x128xf32>
    %c9 = arith.constant 9 : index
    %c0_31 = arith.constant 0 : index
    %56 = vector.load %arg3[%c9, %c0_31] : memref<10x128xf32, #tpu.memory_space<vmem>>, vector<1x128xf32>
    %57 = vector.broadcast %56 : vector<1x128xf32> to vector<32x128xf32>
    %58 = arith.addf %55, %57 : vector<32x128xf32>
    %c64_i32 = arith.constant 64 : i32
    %59 = tpu.dynamic_rotate %58 by %c64_i32 dim 1 : vector<32x128xf32>, i32 -> vector<32x128xf32>
    %60 = arith.addf %29, %59 : vector<32x128xf32>
    %c0_32 = arith.constant 0 : index
    %c0_33 = arith.constant 0 : index
    %61 = vector.load %arg4[%c0_32, %c0_33] : memref<32x128xf32, #tpu.memory_space<vmem>>, vector<32x128xf32>
    tpu.vector_store %arg4[%c0_32, %c0_33], %60 {strides = array<i32>} : memref<32x128xf32, #tpu.memory_space<vmem>>, vector<32x128xf32>,
    return
  }
  func.func @transform_0(%arg0: i32) -> (i32, i32) {
    %c0_i32 = arith.constant 0 : i32
    %c0_i32_0 = arith.constant 0 : i32
    return %arg0, %c0_i32 : i32, i32
  }
  func.func @transform_1(%arg0: i32) -> (i32, i32) {
    %c0_i32 = arith.constant 0 : i32
    %c0_i32_0 = arith.constant 0 : i32
    %c0_i32_1 = arith.constant 0 : i32
    return %c0_i32, %c0_i32_0 : i32, i32
  }
  func.func @transform_2(%arg0: i32) -> (i32, i32) {
    %c0_i32 = arith.constant 0 : i32
    %c0_i32_0 = arith.constant 0 : i32
    %c0_i32_1 = arith.constant 0 : i32
    return %c0_i32, %c0_i32_0 : i32, i32
  }
  func.func @transform_3(%arg0: i32) -> (i32, i32) {
    %c0_i32 = arith.constant 0 : i32
    %c0_i32_0 = arith.constant 0 : i32
    return %arg0, %c0_i32 : i32, i32
  }
}

</mosaic_0001>

<bundles_post_ra>
// kernel: autoencoder_forward.1
= control target key start
LH: loop header
LB: loop body
LE: loop exit
PB: predicated region body
PF: predicated region fallthrough
CT: control target
= control target key end

     0   :  { %8 = vsyncpa [#allocation3], 0  ;;  %s2809_s0 = inlined_call_operand.hbm [shape: f32[64,64], index: 0, kind: input, shape index: {}]   ;;  %s2810_s1 = inlined_call_operand.hbm [shape: f32[1216,128], index: 1, kind: input, shape index: {}]   ;;  %s2811_s2 = inlined_call_operand.hbm [shape: f32[10,128], index: 2, kind: input, shape index: {}]   ;;  %s2812_s3 = inlined_call_operand.vmem [shape: f32[64,128], index: 3, kind: output, shape index: {}]  }
   0x1   :  { %10 = vsyncpa [#allocation3 + $0x1], 0 }
   0x2   :  { %11 = vsyncpa [#allocation5], 0  ;;  %s2596_s12 = smov 0   ;;  %s2598_s13 = smov 0  }
   0x3   :  { %s2600_s14 = smov 0   ;;  %s2602_s15 = smov 0  }
   0x4 LB: > { %s1425_s16 = sadd.s32 4294967295, %s2568_s15   ;;  %p37_p0 = scmp.ne.s32.totalorder %s2560_s13, %s2556_s12  ;;  %s2568_s15 = sphi %s2602_s15, %s2828_s15   ;;  %s2564_s14 = sphi %s2600_s14, %s2827_s14   ;;  %s2560_s13 = sphi %s2598_s13, %s2826_s13   ;;  %s2556_s12 = sphi %s2596_s12, %s2825_s12  }
   0x5   : > { %p2618_p1 = scmp.eq.s32.totalorder %s1425_s16, 0  ;;  %p1427_p2 = scmp.ge.s32.totalorder %s2568_s15, 1 }
   0x6   : > { %p116_p3 = scmp.lt.s32.totalorder %s2568_s15, 3  ;;  %s2570_s20 = smov [#allocation4]  }
   0x7   : > { %s2817_s17 = scalar_select %p2618_p1, 1, 0 }
   0x8   : > { %p2626_p4 = por %p2618_p1, %p37_p0  ;;  %p2630_p5 = pnand %p1427_p2, %p116_p3 }
   0x9   : > { %s128_s21 = sshll.u32 %s2570_s20, 4  ;;  %s2571_s23 = smov [#allocation6]   ;;  %s129_s21 = int_to_ptr.vmem [resolvable:$true] %s128_s21 }
   0xa   : > { %s2818_s18 = scalar_select %p2626_p4, 1, 0 }
   0xb   : > { %s2819_s19 = scalar_select %p2630_p5, 1, 0 }
   0xc   : > { %p2327_p6 = pneg %p2630_p5  ;;  %s141_s24 = sshll.u32 %s2571_s23, 4  ;;  %s2642_s24 = int_to_ptr.vmem [resolvable:$true] %s141_s24 }
   0xd   : > { %s2444_s27 = scalar_lea.hbm %s2810_s1, 19456 }
   0xe   : > { %p2638_p7 = pnand %p2327_p6, %p2618_p1  ;;  %p2445_p8 = scmp.ne.s32.totalorder %s2810_s1, %s2444_s27 }
   0xf   : > { %p2451_p12 = scmp.lt.u32.totalorder %s2444_s27, %s2810_s1 }
  0x10   : > { %p2446_p9 = pneg %p2638_p7 }
  0x12   : > { %p2447_p10 = pnand %p2446_p9, %p2445_p8 }
  0x14   : > { %p2448_p11 = pneg %p2447_p10 }
  0x16   : > { %p2453_p13 = pnand %p2451_p12, %p2448_p11 }
  0x18   : > { %2456 = shalt.err (!%p2453_p13)
}
  0x19   : > { %s2457_s5 = scalar_lea.vmem %s129_s21, 19456  ;;  %p2465_p6 = scmp.lt.s32.totalorder %s129_s21, %s129_s21 }
  0x1a   : > { %p2458_p0 = scmp.ne.s32.totalorder %s129_s21, %s2457_s5  ;;  %p2466_p1 = scmp.lt.s32.totalorder %s2457_s5, %s2457_s5 }
  0x1c   : > { %p2460_p2 = pnand %p2458_p0, %p2446_p9  ;;  %p2467_p4 = por %p2466_p1, %p2465_p6 }
  0x1e   : > { %p2461_p3 = pneg %p2460_p2 }
  0x20   : > { %p2468_p5 = pnand %p2467_p4, %p2461_p3 }
  0x22   : > { %2471 = shalt.err (!%p2468_p5)
}
  0x23   : > { %s2572_s6 = smov 128   ;;  %s2573_s7 = smov 8  }
  0x24   : > { %2330 = dma.hbm_to_vmem [thread:$0]  (!%p2638_p7), %s2810_s1, 19456, %s129_s21, [#allocation5], %s2572_s6, %s2572_s6, %s2573_s7  }
  0x25   : > { %s2472_s12 = scalar_lea.hbm %s2811_s2, 256 }
  0x26   : > { %p2473_p1 = scmp.ne.s32.totalorder %s2811_s2, %s2472_s12  ;;  %p2479_p8 = scmp.lt.u32.totalorder %s2472_s12, %s2811_s2 }
  0x28   : > { %p2475_p4 = pnand %p2473_p1, %p2446_p9 }
  0x2a   : > { %p2476_p5 = pneg %p2475_p4 }
  0x2c   : > { %p2481_p10 = pnand %p2479_p8, %p2476_p5 }
  0x2e   : > { %2484 = shalt.err (!%p2481_p10)
}
  0x2f   : > { %s2485_s21 = scalar_lea.vmem %s2642_s24, 256  ;;  %p2493_p0 = scmp.lt.s32.totalorder %s2642_s24, %s2642_s24 }
  0x30   : > { %p2486_p11 = scmp.ne.s32.totalorder %s2642_s24, %s2485_s21  ;;  %p2494_p2 = scmp.lt.s32.totalorder %s2485_s21, %s2485_s21 }
  0x32   : > { %p2488_p12 = pnand %p2486_p11, %p2446_p9  ;;  %p2495_p3 = por %p2494_p2, %p2493_p0 }
  0x34   : > { %p2489_p13 = pneg %p2488_p12 }
  0x36   : > { %p2496_p6 = pnand %p2495_p3, %p2489_p13 }
  0x38   : > { %2499 = shalt.err (!%p2496_p6)
}
  0x39   : > { %2333 = dma.hbm_to_vmem [thread:$0]  (!%p2638_p7), %s2811_s2, 256, %s2642_s24, [#allocation5], %s2572_s6, %s2572_s6, %s2573_s7  }
  0x3a   : > { %s2698_s29 = sadd.s32 1, %s2568_s15   ;;  %s24_s22 = sadd.s32 1, %s2564_s14 }
  0x3b   : > { %s21_s30 = ssub.s32 %s2568_s15, %s2698_s29  ;;  %p31_p9 = scmp.ne.s32.totalorder %s2564_s14, %s2560_s13 }
  0x3c   : > { %p22_p1 = scmp.eq.s32.totalorder %s21_s30, 0  ;;  %p32_p4 = scmp.eq.s32.totalorder %s2568_s15, 0 }
  0x3d   : > { %p2340_p5 = scmp.lt.s32.totalorder %s2568_s15, 2  ;;  %s155_s4 = sand.u32 1, %s2564_s14  }
  0x3e   : > { %s2709_s5 = scalar_select %p22_p1, %s2564_s14, %s24_s22  }
  0x3f   : > { %p33_p8 = por %p32_p4, %p31_p9  ;;  %s1431_s8 = sshll.u32 %s155_s4, 5 }
  0x40   : > { %s1456_s9 = sshll.u32 %s2568_s15, 9  ;;  %s159_s24 = scalar_lea.vmem [#allocation2], %s1431_s8 }
  0x41   : > { %s2715_s12 = scalar_lea.hbm %s2809_s0, %s1456_s9  ;;  %s166_s20 = sshll.u32 %s159_s24, 4  ;;  %s2721_s20 = int_to_ptr.vmem [resolvable:$true] %s166_s20 }
  0x42   : > { %p2717_p7 = pnand %p2340_p5, %p33_p8  ;;  %s2723_s25 = scalar_lea.sflag [#allocation3], %s155_s4 }
  0x43   : > { %s2500_s26 = scalar_lea.hbm %s2715_s12, 512  ;;  %s2505_s28 = scalar_lea.hbm %s2809_s0, 1024 }
  0x44   : > { %p2501_p10 = scmp.ne.s32.totalorder %s2715_s12, %s2500_s26  ;;  %p2502_p11 = pneg %p2717_p7 }
  0x45   : > { %p2506_p0 = scmp.lt.u32.totalorder %s2715_s12, %s2809_s0  ;;  %p2507_p2 = scmp.lt.u32.totalorder %s2505_s28, %s2500_s26 }
  0x46   : > { %p2503_p12 = pnand %p2502_p11, %p2501_p10  ;;  %p2509_p6 = scmp.lt.u32.totalorder %s2500_s26, %s2715_s12 }
  0x47   : > { %p2508_p3 = por %p2507_p2, %p2506_p0 }
  0x48   : > { %p2504_p13 = pneg %p2503_p12 }
  0x49   : > { %p2510_p9 = por %p2509_p6, %p2508_p3 }
  0x4b   : > { %p2511_p1 = pnand %p2510_p9, %p2504_p13 }
  0x4d   : > { %2514 = shalt.err (!%p2511_p1)
}
  0x4e   : > { %s2515_s4 = scalar_lea.vmem %s2721_s20, 512  ;;  %s2574_s8 = smov [#allocation2]  }
  0x4f   : > { %p2516_p4 = scmp.ne.s32.totalorder %s2721_s20, %s2515_s4  ;;  %s2520_s9 = sshll.u32 %s2574_s8, 4  ;;  %s2521_s9 = int_to_ptr.vmem [resolvable:$false] %s2520_s9 }
  0x50   : > { %s2522_s10 = scalar_lea.vmem %s2521_s9, 1024  ;;  %p2523_p10 = scmp.lt.s32.totalorder %s2721_s20, %s2521_s9 }
  0x51   : > { %p2518_p5 = pnand %p2516_p4, %p2502_p11  ;;  %p2524_p12 = scmp.lt.s32.totalorder %s2522_s10, %s2515_s4 }
  0x53   : > { %p2519_p8 = pneg %p2518_p5  ;;  %p2525_p0 = por %p2524_p12, %p2523_p10 }
  0x55   : > { %p2526_p2 = pnand %p2525_p0, %p2519_p8 }
  0x57   : > { %2529 = shalt.err (!%p2526_p2)
}
  0x58   : > { %2337 = dma.hbm_to_vmem [thread:$0]  (!%p2717_p7), %s2715_s12, 512, %s2721_s20, %s2723_s25, %s2572_s6, %s2572_s6, %s2573_s7  }
  0x59   : > { %p2822_p11 = scmp.ne.s32.totalorder %s2819_s19, 0 }
  0x5a   : > { %s180_s11 = sand.u32 (!%p2822_p11), 1, %s2560_s13   ;;  %p2823_p13 = scmp.ne.s32.totalorder (!%p2822_p11), %s2818_s18, 0 }
  0x5b   : > { %178 = sbr.rel (%p2822_p11) target bundleno = 2494 (0x9be), region = 32  ;;  %s1435_s24 = sshll.u32 (!%p2822_p11), %s180_s11, 5 }
  0x5c   : > { %s181_s26 = scalar_lea.sflag (!%p2822_p11), [#allocation3], %s180_s11  ;;  %s2757_s21 = scalar_lea.vmem (!%p2822_p11), [#allocation2], %s1435_s24 }
  0x62   : > { %2547 = dma.done.wait (%p2823_p13), %s181_s26, 512  }
  0x63   : > { %2549 = vsyncadd (%p2823_p13), %s181_s26, 4294966784  ;;  %p2824_p3 = scmp.ne.s32.totalorder %s2817_s17, 0 }
  0x65   : > { %2551 = dma.done.wait (%p2824_p3), [#allocation5], 19712  }
  0x66   : > { %2553 = vsyncadd (%p2824_p3), [#allocation5], 4294947584  ;;  %v226_v0 = vld [vmem:[#allocation4] sm:$0xff]  ;;  %v227_v1 = vld [vmem:[#allocation4 + $0x8] sm:$0xff]  ;;  %vm239_vm0 = vcmask 523264   ;;  %s2575_s17 = smov 64  }
  0x67   : > { %v228_v2 = vld [vmem:[#allocation4 + $0x10] sm:$0xff]  ;;  %v2013_v3 = vpack.c.bf16 %v227_v1, %v226_v0  ;;  %v229_v4 = vld [vmem:[#allocation4 + $0x18] sm:$0xff]  ;;  %v230_v6 = vld [vmem:[#allocation4 + $0x20] sm:$0xff]  ;;  %s1438_s18 = sshll.u32 %s1425_s16, 2 }
  0x68   : > { %v2017_v5 = vpack.c.bf16 %v229_v4, %v228_v2  ;;  %v231_v7 = vld [vmem:[#allocation4 + $0x28] sm:$0xff]  ;;  %v222_v8 = vld [vmem:[%s2757_s21] sm:$0xff]  ;;  %v343_v11 = vld [vmem:[#allocation4 + $0x50] sm:$0xff]  ;;  %p217_p7 = scmp.lt.s32.totalorder %s1438_s18, 7 }
  0x69   : > { %2014 = vmatprep.subr.bf16.mxu0 %v2013_v3  ;;  %1665 = vmatprep.mubr.msk.f32.mxu0 %vm239_vm0, %v222_v8  ;;  %v341_v9 = vld [vmem:[#allocation4 + $0x40] sm:$0xff]  ;;  %v342_v10 = vld [vmem:[#allocation4 + $0x48] sm:$0xff]  ;;  %v2021_v12 = vpack.c.bf16 %v231_v7, %v230_v6  ;;  %v232_v13 = vld [vmem:[#allocation4 + $0x30] sm:$0xff] }
  0x6a   : > { %2016 = vmatpush3.bf16.msra.mxu0 %v2013_v3  ;;  %v2029_v14 = vpack.c.bf16 %v342_v10, %v341_v9  ;;  %v344_v15 = vld [vmem:[#allocation4 + $0x58] sm:$0xff]  ;;  %v345_v18 = vld [vmem:[#allocation4 + $0x60] sm:$0xff]  ;;  %v346_v19 = vld [vmem:[#allocation4 + $0x68] sm:$0xff]  ;;  %s2830_s18 = smov (!%p217_p7, %s1438_s18), 7 }
  0x6b   : > { %2018 = vmatprep.subr.bf16.mxu0 %v2017_v5  ;;  %v233_v16 = vld [vmem:[#allocation4 + $0x38] sm:$0xff]  ;;  %v2033_v17 = vpack.c.bf16 %v344_v15, %v343_v11  ;;  %v2037_v21 = vpack.c.bf16 %v346_v19, %v345_v18  ;;  %v347_v22 = vld [vmem:[#allocation4 + $0x70] sm:$0xff]  ;;  %v223_v25 = vld [vmem:[%s2757_s21 + $0x8] sm:$0xff]  ;;  %s1439_s19 = sshll.u32 %s2830_s18, 3 }
  0x6c   : > { %2030 = vmatprep.subr.bf16.mxu1 %v2029_v14  ;;  %v2025_v20 = vpack.c.bf16 %v233_v16, %v232_v13  ;;  %v348_v23 = vld [vmem:[#allocation4 + $0x78] sm:$0xff]  ;;  %v224_v26 = vld [vmem:[%s2757_s21 + $0x10] sm:$0xff]  ;;  %v349_v28 = vld [vmem:[#allocation4 + $0x80] sm:$0xff]  ;;  %s220_s12 = scalar_lea.vmem %s2812_s3, %s1439_s19 }
  0x6d   : > { %2032 = vmatpush3.bf16.msra.mxu1 %v2029_v14  ;;  %v2041_v24 = vpack.c.bf16 %v348_v23, %v347_v22  ;;  %v225_v27 = vld [vmem:[%s2757_s21 + $0x18] sm:$0xff]  ;;  %v350_v29 = vld [vmem:[#allocation4 + $0x88] sm:$0xff]  ;;  %v351_v31 = vld [vmem:[#allocation4 + $0x90] sm:$0xff] }
  0x6e   : > { %2020 = vmatpush3.bf16.msra.mxu0 %v2017_v5  ;;  %2034 = vmatprep.subr.bf16.mxu1 %v2033_v17  ;;  %v2045_v30 = vpack.c.bf16 %v350_v29, %v349_v28  ;;  %v352_v32 = vld [vmem:[#allocation4 + $0x98] sm:$0xff]  ;;  %v353_v34 = vld [vmem:[#allocation4 + $0xa0] sm:$0xff]  ;;  %v354_v35 = vld [vmem:[#allocation4 + $0xa8] sm:$0xff] }
  0x6f   : > { %2022 = vmatprep.subr.bf16.mxu0 %v2021_v12  ;;  %v2049_v33 = vpack.c.bf16 %v352_v32, %v351_v31  ;;  %v2053_v36 = vpack.c.bf16 %v354_v35, %v353_v34  ;;  %v355_v37 = vld [vmem:[#allocation4 + $0xb0] sm:$0xff]  ;;  %v356_v38 = vld [vmem:[#allocation4 + $0xb8] sm:$0xff]  ;;  %v451_v40 = vld [vmem:[#allocation4 + $0xc0] sm:$0xff] }
  0x70   : > { %v2057_v39 = vpack.c.bf16 %v356_v38, %v355_v37  ;;  %v452_v41 = vld [vmem:[#allocation4 + $0xc8] sm:$0xff]  ;;  %v453_v42 = vld [vmem:[#allocation4 + $0xd0] sm:$0xff]  ;;  %v454_v44 = vld [vmem:[#allocation4 + $0xd8] sm:$0xff] }
  0x71   : > { %2036 = vmatpush3.bf16.msra.mxu1 %v2033_v17  ;;  %v2061_v43 = vpack.c.bf16 %v452_v41, %v451_v40  ;;  %v2065_v45 = vpack.c.bf16 %v454_v44, %v453_v42  ;;  %v455_v46 = vld [vmem:[#allocation4 + $0xe0] sm:$0xff]  ;;  %v456_v47 = vld [vmem:[#allocation4 + $0xe8] sm:$0xff]  ;;  %v457_v49 = vld [vmem:[#allocation4 + $0xf0] sm:$0xff] }
  0x72   : > { %2024 = vmatpush3.bf16.msra.mxu0 %v2021_v12  ;;  %2038 = vmatprep.subr.bf16.mxu1 %v2037_v21  ;;  %v2069_v48 = vpack.c.bf16 %v456_v47, %v455_v46  ;;  %v458_v50 = vld [vmem:[#allocation4 + $0xf8] sm:$0xff]  ;;  %v1440_v52 = vld [vmem:[#allocation6] ss:$0 sm:$0xff]  ;;  %v460_v2 = vld [vmem:[#allocation4 + $0x108] sm:$0xff] }
  0x73   : > { %2026 = vmatprep.subr.bf16.mxu0 %v2025_v20  ;;  %v2073_v51 = vpack.c.bf16 %v458_v50, %v457_v49  ;;  %v459_v1 = vld [vmem:[#allocation4 + $0x100] sm:$0xff]  ;;  %v461_v4 = vld [vmem:[#allocation4 + $0x110] sm:$0xff]  ;;  %v462_v5 = vld [vmem:[#allocation4 + $0x118] sm:$0xff] }
  0x74   : > { %v2077_v3 = vpack.c.bf16 %v460_v2, %v459_v1  ;;  %v2081_v6 = vpack.c.bf16 %v462_v5, %v461_v4  ;;  %v463_v7 = vld [vmem:[#allocation4 + $0x120] sm:$0xff]  ;;  %v464_v8 = vld [vmem:[#allocation4 + $0x128] sm:$0xff]  ;;  %v465_v10 = vld [vmem:[#allocation4 + $0x130] sm:$0xff] }
  0x75   : > { %2040 = vmatpush3.bf16.msra.mxu1 %v2037_v21  ;;  %v2085_v9 = vpack.c.bf16 %v464_v8, %v463_v7  ;;  %v466_v11 = vld [vmem:[#allocation4 + $0x138] sm:$0xff]  ;;  %v561_v13 = vld [vmem:[#allocation4 + $0x140] sm:$0xff]  ;;  %v562_v14 = vld [vmem:[#allocation4 + $0x148] sm:$0xff] }
  0x76   : > { %2028 = vmatpush3.bf16.msra.mxu0 %v2025_v20  ;;  %2042 = vmatprep.subr.bf16.mxu1 %v2041_v24  ;;  %v2089_v12 = vpack.c.bf16 %v466_v11, %v465_v10  ;;  %v563_v15 = vld [vmem:[#allocation4 + $0x150] sm:$0xff]  ;;  %v2093_v16 = vpack.c.bf16 %v562_v14, %v561_v13  ;;  %v564_v17 = vld [vmem:[#allocation4 + $0x158] sm:$0xff]  ;;  %v565_v19 = vld [vmem:[#allocation4 + $0x160] sm:$0xff] }
  0x77   : > { %2062 = vmatprep.subr.bf16.mxu0 %v2061_v43  ;;  %v2097_v18 = vpack.c.bf16 %v564_v17, %v563_v15  ;;  %v566_v20 = vld [vmem:[#allocation4 + $0x168] sm:$0xff]  ;;  %v567_v22 = vld [vmem:[#allocation4 + $0x170] sm:$0xff]  ;;  %v568_v23 = vld [vmem:[#allocation4 + $0x178] sm:$0xff] }
  0x78   : > { %v2101_v21 = vpack.c.bf16 %v566_v20, %v565_v19  ;;  %v569_v38 = vld [vmem:[#allocation4 + $0x180] sm:$0xff]  ;;  %v571_v41 = vld [vmem:[#allocation4 + $0x190] sm:$0xff]  ;;  %v572_v42 = vld [vmem:[#allocation4 + $0x198] sm:$0xff] }
  0x79   : > { %1666 = vmatmul.mubr.msk.f32.vlgmr.msra.gmra.mrb[0].mxu0 %vm239_vm0, %v223_v25  ;;  %2044 = vmatpush3.bf16.msra.mxu1 %v2041_v24  ;;  %v2105_v24 = vpack.c.bf16 %v568_v23, %v567_v22  ;;  %v1445_v25 = vld [vmem:[#allocation6 + $0x1] ss:$0 sm:$0xff]  ;;  %v575_v47 = vld [vmem:[#allocation4 + $0x1b0] sm:$0xff]  ;;  %v682_v15 = vld [vmem:[#allocation4 + $0x218] sm:$0xff] }
  0x7a   : > { %1668 = vmatprep.mubr.msk.f32.mxu0 %vm239_vm0, %v224_v26  ;;  %2046 = vmatprep.subr.bf16.mxu1 %v2045_v30  ;;  %v573_v44 = vld [vmem:[#allocation4 + $0x1a0] sm:$0xff]  ;;  %v681_v14 = vld [vmem:[#allocation4 + $0x210] sm:$0xff] }
  0x7b   : > { %2064 = vmatpush3.bf16.msra.mxu0 %v2061_v43  ;;  %v2113_v43 = vpack.c.bf16 %v572_v42, %v571_v41  ;;  %v671_v50 = vld [vmem:[#allocation4 + $0x1c0] sm:$0xff]  ;;  %v685_v20 = vld [vmem:[#allocation4 + $0x230] sm:$0xff]  ;;  %v790_v42 = vld [vmem:[#allocation4 + $0x2a8] sm:$0xff] }
  0x7c   : > { %2066 = vmatprep.subr.bf16.mxu0 %v2065_v45  ;;  %v679_v11 = vld [vmem:[#allocation4 + $0x200] sm:$0xff] }
  0x7d   : > { %1669 = vmatmul.mubr.msk.f32.gmra.mrb[2].mxu0 %vm239_vm0, %v225_v27  ;;  %2048 = vmatpush3.bf16.msra.mxu1 %v2045_v30  ;;  %v683_v17 = vld [vmem:[#allocation4 + $0x220] sm:$0xff] }
  0x7e   : > { %2050 = vmatprep.subr.bf16.mxu1 %v2049_v33  ;;  %v777_v23 = vld [vmem:[#allocation4 + $0x240] sm:$0xff] }
  0x7f   : > { %2068 = vmatpush3.bf16.msra.mxu0 %v2065_v45  ;;  %v574_v45 = vld [vmem:[#allocation4 + $0x1a8] sm:$0xff]  ;;  %v789_v41 = vld [vmem:[#allocation4 + $0x2a0] sm:$0xff] }
  0x80   : > { %2070 = vmatprep.subr.bf16.mxu0 %v2069_v48  ;;  %v2117_v46 = vpack.c.bf16 %v574_v45, %v573_v44  ;;  %v1447_v44 = vld [vmem:[#allocation6 + $0x3] ss:$0 sm:$0xff] }
  0x81   : > { %2052 = vmatpush3.bf16.msra.mxu1 %v2049_v33 }
  0x82   : > { %2054 = vmatprep.subr.bf16.mxu1 %v2053_v36 }
  0x83   : > { %2072 = vmatpush3.bf16.msra.mxu0 %v2069_v48  ;;  %v576_v48 = vld [vmem:[#allocation4 + $0x1b8] sm:$0xff] }
  0x84   : > { %2074 = vmatprep.subr.bf16.mxu0 %v2073_v51  ;;  %v2121_v49 = vpack.c.bf16 %v576_v48, %v575_v47 }
  0x85   : > { %2056 = vmatpush3.bf16.msra.mxu1 %v2053_v36 }
  0x86   : > { %2058 = vmatprep.subr.bf16.mxu1 %v2057_v39 }
  0x87   : > { %2076 = vmatpush3.bf16.msra.mxu0 %v2073_v51  ;;  %v672_v51 = vld [vmem:[#allocation4 + $0x1c8] sm:$0xff] }
  0x88   : > { %2078 = vmatprep.subr.bf16.mxu0 %v2077_v3 }
  0x89   : > { %2060 = vmatpush3.bf16.msra.mxu1 %v2057_v39  ;;  %v570_v39 = vld [vmem:[#allocation4 + $0x188] sm:$0xff] }
  0x8a   : > { %2094 = vmatprep.subr.bf16.mxu1 %v2093_v16  ;;  %v2109_v40 = vpack.c.bf16 %v570_v39, %v569_v38  ;;  %v787_v38 = vld [vmem:[#allocation4 + $0x290] sm:$0xff]  ;;  %v788_v39 = vld [vmem:[#allocation4 + $0x298] sm:$0xff] }
  0x8b   : > { %2080 = vmatpush3.bf16.msra.mxu0 %v2077_v3 }
  0x8c   : > { %2082 = vmatprep.subr.bf16.mxu0 %v2081_v6 }
  0x8f   : > { %2084 = vmatpush3.bf16.msra.mxu0 %v2081_v6 }
  0x90   : > { %2086 = vmatprep.subr.bf16.mxu0 %v2085_v9 }
  0x93   : > { %2088 = vmatpush3.bf16.msra.mxu0 %v2085_v9 }
  0x94   : > { %2090 = vmatprep.subr.bf16.mxu0 %v2089_v12 }
  0x97   : > { %2092 = vmatpush3.bf16.msra.mxu0 %v2089_v12  ;;  %v680_v12 = vld [vmem:[#allocation4 + $0x208] sm:$0xff] }
  0x98   : > { %v2141_v13 = vpack.c.bf16 %v680_v12, %v679_v11 }
 0x14c   : > { %v1667_v53 = vpop.f32.mrb[0].mxu0 }
 0x14d   : > { %v324_v54 = vadd.f32 %v1667_v53, %v1440_v52  ;;  %v318_v55 = vpop.f32.mrb[1].mxu0  ;;  %v2125_v53 = vpack.c.bf16 %v672_v51, %v671_v50 }
 0x14e   : > { %v319_v56 = vadd.f32 %v1440_v52, %v318_v55 }
 0x14f   : > { %2126 = vmatprep.subr.bf16.mxu0 %v2125_v53 }
 0x150   : > { %2380 = vtanh.f32 %v319_v56  ;;  %v1670_v57 = vpop.f32.mrb[2].mxu0  ;;  %v675_v56 = vld [vmem:[#allocation4 + $0x1e0] sm:$0xff] }
 0x151   : > { %2382 = vtanh.f32 %v324_v54  ;;  %v334_v58 = vadd.f32 %v1670_v57, %v1440_v52  ;;  %v328_v59 = vpop.f32.mrb[3].mxu0  ;;  %v674_v54 = vld [vmem:[#allocation4 + $0x1d8] sm:$0xff]  ;;  %v676_v57 = vld [vmem:[#allocation4 + $0x1e8] sm:$0xff] }
 0x152   : > { %v329_v60 = vadd.f32 %v1440_v52, %v328_v59  ;;  %v673_v52 = vld [vmem:[#allocation4 + $0x1d0] sm:$0xff] }
 0x153   : > { %v2129_v55 = vpack.c.bf16 %v674_v54, %v673_v52  ;;  %v677_v59 = vld [vmem:[#allocation4 + $0x1f0] sm:$0xff] }
 0x154   : > { %2384 = vtanh.f32 %v329_v60  ;;  %v678_v60 = vld [vmem:[#allocation4 + $0x1f8] sm:$0xff] }
 0x155   : > { %2386 = vtanh.f32 %v334_v58  ;;  %v2133_v58 = vpack.c.bf16 %v676_v57, %v675_v56  ;;  %v791_v57 = vld [vmem:[#allocation4 + $0x2b0] sm:$0xff] }
 0x15a   : > { %v2381_v61 = vpop.eup %2380 }
 0x15b   : > { %v2383_v62 = vpop.eup %2382  ;;  %1703 = vmatprep.mubr.f32.mxu1 %v2381_v61  ;;  %v2137_v61 = vpack.c.bf16 %v678_v60, %v677_v59  ;;  %v887_v60 = vld [vmem:[#allocation4 + $0x2c0] sm:$0xff] }
 0x15c   : > { %1704 = vmatmul.mubr.f32.vlgmr.msra.gmra.mrb[0].mxu1 %v2383_v62  ;;  %v1446_v62 = vld [vmem:[#allocation6 + $0x2] ss:$0 sm:$0xff] }
 0x15d   : > { %2096 = vmatpush3.bf16.msra.mxu1 %v2093_v16  ;;  %v2145_v16 = vpack.c.bf16 %v682_v15, %v681_v14 }
 0x15e   : > { %v2385_v63 = vpop.eup %2384  ;;  %2098 = vmatprep.subr.bf16.mxu1 %v2097_v18 }
 0x15f   : > { %v2387_v0 = vpop.eup %2386  ;;  %1706 = vmatprep.mubr.f32.mxu1 %v2385_v63 }
 0x160   : > { %1707 = vmatmul.mubr.f32.gmra.mrb[2].mxu1 %v2387_v0 }
 0x161   : > { %2100 = vmatpush3.bf16.msra.mxu1 %v2097_v18  ;;  %v684_v18 = vld [vmem:[#allocation4 + $0x228] sm:$0xff] }
 0x162   : > { %2102 = vmatprep.subr.bf16.mxu1 %v2101_v21  ;;  %v2149_v19 = vpack.c.bf16 %v684_v18, %v683_v17  ;;  %v895_v17 = vld [vmem:[#allocation4 + $0x300] sm:$0xff]  ;;  %v896_v18 = vld [vmem:[#allocation4 + $0x308] sm:$0xff] }
 0x165   : > { %2104 = vmatpush3.bf16.msra.mxu1 %v2101_v21  ;;  %v686_v21 = vld [vmem:[#allocation4 + $0x238] sm:$0xff] }
 0x166   : > { %2106 = vmatprep.subr.bf16.mxu1 %v2105_v24  ;;  %v2153_v22 = vpack.c.bf16 %v686_v21, %v685_v20  ;;  %v897_v20 = vld [vmem:[#allocation4 + $0x310] sm:$0xff]  ;;  %v898_v21 = vld [vmem:[#allocation4 + $0x318] sm:$0xff] }
 0x169   : > { %2108 = vmatpush3.bf16.msra.mxu1 %v2105_v24  ;;  %v778_v24 = vld [vmem:[#allocation4 + $0x248] sm:$0xff] }
 0x16a   : > { %2110 = vmatprep.subr.bf16.mxu1 %v2109_v40 }
 0x16d   : > { %2112 = vmatpush3.bf16.msra.mxu1 %v2109_v40  ;;  %v2177_v40 = vpack.c.bf16 %v788_v39, %v787_v38  ;;  %v1003_v38 = vld [vmem:[#allocation4 + $0x370] sm:$0xff]  ;;  %v1004_v39 = vld [vmem:[#allocation4 + $0x378] sm:$0xff] }
 0x16e   : > { %2114 = vmatprep.subr.bf16.mxu1 %v2113_v43 }
 0x171   : > { %2116 = vmatpush3.bf16.msra.mxu1 %v2113_v43  ;;  %v2181_v43 = vpack.c.bf16 %v790_v42, %v789_v41  ;;  %v1449_v41 = vld [vmem:[#allocation6 + $0x5] ss:$0 sm:$0xff] }
 0x172   : > { %2118 = vmatprep.subr.bf16.mxu1 %v2117_v46 }
 0x175   : > { %2120 = vmatpush3.bf16.msra.mxu1 %v2117_v46 }
 0x176   : > { %2122 = vmatprep.subr.bf16.mxu1 %v2121_v49 }
 0x179   : > { %2124 = vmatpush3.bf16.msra.mxu1 %v2121_v49 }
 0x22f   : > { %v1705_v26 = vpop.f32.mrb[0].mxu1 }
 0x230   : > { %v434_v27 = vadd.f32 %v1705_v26, %v1445_v25  ;;  %v428_v28 = vpop.f32.mrb[1].mxu1  ;;  %v2157_v26 = vpack.c.bf16 %v778_v24, %v777_v23  ;;  %v899_v23 = vld [vmem:[#allocation4 + $0x320] sm:$0xff]  ;;  %v900_v24 = vld [vmem:[#allocation4 + $0x328] sm:$0xff] }
 0x231   : > { %v429_v29 = vadd.f32 %v1445_v25, %v428_v28 }
 0x232   : > { %2158 = vmatprep.subr.bf16.mxu1 %v2157_v26 }
 0x233   : > { %2388 = vtanh.f32 %v429_v29  ;;  %v1708_v30 = vpop.f32.mrb[2].mxu1  ;;  %v781_v29 = vld [vmem:[#allocation4 + $0x260] sm:$0xff] }
 0x234   : > { %2390 = vtanh.f32 %v434_v27  ;;  %v444_v31 = vadd.f32 %v1708_v30, %v1445_v25  ;;  %v438_v32 = vpop.f32.mrb[3].mxu1  ;;  %v780_v27 = vld [vmem:[#allocation4 + $0x258] sm:$0xff]  ;;  %v782_v30 = vld [vmem:[#allocation4 + $0x268] sm:$0xff] }
 0x235   : > { %v439_v33 = vadd.f32 %v1445_v25, %v438_v32  ;;  %v779_v25 = vld [vmem:[#allocation4 + $0x250] sm:$0xff] }
 0x236   : > { %v2161_v28 = vpack.c.bf16 %v780_v27, %v779_v25  ;;  %v783_v32 = vld [vmem:[#allocation4 + $0x270] sm:$0xff]  ;;  %v2213_v25 = vpack.c.bf16 %v900_v24, %v899_v23  ;;  %v902_v27 = vld [vmem:[#allocation4 + $0x338] sm:$0xff] }
 0x237   : > { %2392 = vtanh.f32 %v439_v33  ;;  %v784_v33 = vld [vmem:[#allocation4 + $0x278] sm:$0xff] }
 0x238   : > { %2394 = vtanh.f32 %v444_v31  ;;  %v2165_v31 = vpack.c.bf16 %v782_v30, %v781_v29  ;;  %v997_v29 = vld [vmem:[#allocation4 + $0x340] sm:$0xff]  ;;  %v998_v30 = vld [vmem:[#allocation4 + $0x348] sm:$0xff] }
 0x23d   : > { %v2389_v34 = vpop.eup %2388 }
 0x23e   : > { %v2391_v35 = vpop.eup %2390  ;;  %1741 = vmatprep.mubr.f32.mxu0 %v2389_v34  ;;  %v2169_v34 = vpack.c.bf16 %v784_v33, %v783_v32  ;;  %v2221_v32 = vpack.c.bf16 %v998_v30, %v997_v29  ;;  %v1000_v33 = vld [vmem:[#allocation4 + $0x358] sm:$0xff] }
 0x23f   : > { %1742 = vmatmul.mubr.f32.vlgmr.msra.gmra.mrb[4].mxu0 %v2391_v35  ;;  %v785_v35 = vld [vmem:[#allocation4 + $0x280] sm:$0xff] }
 0x240   : > { %2128 = vmatpush3.bf16.msra.mxu0 %v2125_v53 }
 0x241   : > { %v2393_v36 = vpop.eup %2392  ;;  %2130 = vmatprep.subr.bf16.mxu0 %v2129_v55 }
 0x242   : > { %v2395_v37 = vpop.eup %2394  ;;  %1744 = vmatprep.mubr.f32.mxu0 %v2393_v36  ;;  %v786_v36 = vld [vmem:[#allocation4 + $0x288] sm:$0xff] }
 0x243   : > { %1745 = vmatmul.mubr.f32.gmra.mrb[6].mxu0 %v2395_v37  ;;  %v2173_v37 = vpack.c.bf16 %v786_v36, %v785_v35  ;;  %v1001_v35 = vld [vmem:[#allocation4 + $0x360] sm:$0xff]  ;;  %v1002_v36 = vld [vmem:[#allocation4 + $0x368] sm:$0xff] }
 0x244   : > { %2132 = vmatpush3.bf16.msra.mxu0 %v2129_v55 }
 0x245   : > { %2134 = vmatprep.subr.bf16.mxu0 %v2133_v58 }
 0x248   : > { %2136 = vmatpush3.bf16.msra.mxu0 %v2133_v58  ;;  %v792_v58 = vld [vmem:[#allocation4 + $0x2b8] sm:$0xff] }
 0x249   : > { %2138 = vmatprep.subr.bf16.mxu0 %v2137_v61  ;;  %v2185_v59 = vpack.c.bf16 %v792_v58, %v791_v57  ;;  %v1007_v57 = vld [vmem:[#allocation4 + $0x390] sm:$0xff]  ;;  %v1008_v58 = vld [vmem:[#allocation4 + $0x398] sm:$0xff] }
 0x24c   : > { %2140 = vmatpush3.bf16.msra.mxu0 %v2137_v61  ;;  %v888_v61 = vld [vmem:[#allocation4 + $0x2c8] sm:$0xff] }
 0x24d   : > { %2142 = vmatprep.subr.bf16.mxu0 %v2141_v13 }
 0x250   : > { %2144 = vmatpush3.bf16.msra.mxu0 %v2141_v13 }
 0x251   : > { %2146 = vmatprep.subr.bf16.mxu0 %v2145_v16 }
 0x254   : > { %2148 = vmatpush3.bf16.msra.mxu0 %v2145_v16 }
 0x255   : > { %2150 = vmatprep.subr.bf16.mxu0 %v2149_v19 }
 0x258   : > { %2152 = vmatpush3.bf16.msra.mxu0 %v2149_v19  ;;  %v2205_v19 = vpack.c.bf16 %v896_v18, %v895_v17  ;;  %v1450_v18 = vld [vmem:[#allocation6 + $0x6] ss:$0 sm:$0xff] }
 0x259   : > { %2154 = vmatprep.subr.bf16.mxu0 %v2153_v22 }
 0x25c   : > { %2156 = vmatpush3.bf16.msra.mxu0 %v2153_v22  ;;  %v2209_v22 = vpack.c.bf16 %v898_v21, %v897_v20 }
 0x312   : > { %v1743_v63 = vpop.f32.mrb[4].mxu0 }
 0x313   : > { %v544_v0 = vadd.f32 %v1743_v63, %v1446_v62  ;;  %v538_v1 = vpop.f32.mrb[5].mxu0  ;;  %v2189_v63 = vpack.c.bf16 %v888_v61, %v887_v60  ;;  %v1009_v60 = vld [vmem:[#allocation4 + $0x3a0] sm:$0xff]  ;;  %v1010_v61 = vld [vmem:[#allocation4 + $0x3a8] sm:$0xff] }
 0x314   : > { %v539_v2 = vadd.f32 %v1446_v62, %v538_v1 }
 0x315   : > { %2190 = vmatprep.subr.bf16.mxu0 %v2189_v63 }
 0x316   : > { %2396 = vtanh.f32 %v539_v2  ;;  %v1746_v3 = vpop.f32.mrb[6].mxu0  ;;  %v891_v2 = vld [vmem:[#allocation4 + $0x2e0] sm:$0xff] }
 0x317   : > { %2398 = vtanh.f32 %v544_v0  ;;  %v554_v4 = vadd.f32 %v1746_v3, %v1446_v62  ;;  %v548_v5 = vpop.f32.mrb[7].mxu0  ;;  %v890_v0 = vld [vmem:[#allocation4 + $0x2d8] sm:$0xff]  ;;  %v892_v3 = vld [vmem:[#allocation4 + $0x2e8] sm:$0xff] }
 0x318   : > { %v549_v6 = vadd.f32 %v1446_v62, %v548_v5  ;;  %v889_v62 = vld [vmem:[#allocation4 + $0x2d0] sm:$0xff] }
 0x319   : > { %v2193_v1 = vpack.c.bf16 %v890_v0, %v889_v62  ;;  %v893_v5 = vld [vmem:[#allocation4 + $0x2f0] sm:$0xff]  ;;  %v2245_v62 = vpack.c.bf16 %v1010_v61, %v1009_v60  ;;  %v1012_v0 = vld [vmem:[#allocation4 + $0x3b8] sm:$0xff] }
 0x31a   : > { %2400 = vtanh.f32 %v549_v6  ;;  %v894_v6 = vld [vmem:[#allocation4 + $0x2f8] sm:$0xff] }
 0x31b   : > { %2402 = vtanh.f32 %v554_v4  ;;  %v2197_v4 = vpack.c.bf16 %v892_v3, %v891_v2  ;;  %v1107_v2 = vld [vmem:[#allocation4 + $0x3c0] sm:$0xff]  ;;  %v1108_v3 = vld [vmem:[#allocation4 + $0x3c8] sm:$0xff] }
 0x320   : > { %v2397_v7 = vpop.eup %2396 }
 0x321   : > { %v2399_v8 = vpop.eup %2398  ;;  %1779 = vmatprep.mubr.f32.mxu1 %v2397_v7  ;;  %v2201_v7 = vpack.c.bf16 %v894_v6, %v893_v5  ;;  %v2253_v5 = vpack.c.bf16 %v1108_v3, %v1107_v2  ;;  %v1110_v6 = vld [vmem:[#allocation4 + $0x3d8] sm:$0xff] }
 0x322   : > { %1780 = vmatmul.mubr.f32.vlgmr.msra.gmra.mrb[4].mxu1 %v2399_v8  ;;  %v1448_v8 = vld [vmem:[#allocation6 + $0x4] ss:$0 sm:$0xff] }
 0x323   : > { %2160 = vmatpush3.bf16.msra.mxu1 %v2157_v26  ;;  %v901_v26 = vld [vmem:[#allocation4 + $0x330] sm:$0xff] }
 0x324   : > { %v2401_v9 = vpop.eup %2400  ;;  %2162 = vmatprep.subr.bf16.mxu1 %v2161_v28 }
 0x325   : > { %v2403_v10 = vpop.eup %2402  ;;  %1782 = vmatprep.mubr.f32.mxu1 %v2401_v9 }
 0x326   : > { %1783 = vmatmul.mubr.f32.gmra.mrb[6].mxu1 %v2403_v10 }
 0x327   : > { %2164 = vmatpush3.bf16.msra.mxu1 %v2161_v28  ;;  %v2217_v28 = vpack.c.bf16 %v902_v27, %v901_v26 }
 0x328   : > { %2166 = vmatprep.subr.bf16.mxu1 %v2165_v31 }
 0x32b   : > { %2168 = vmatpush3.bf16.msra.mxu1 %v2165_v31  ;;  %v999_v31 = vld [vmem:[#allocation4 + $0x350] sm:$0xff] }
 0x32c   : > { %2170 = vmatprep.subr.bf16.mxu1 %v2169_v34 }
 0x32f   : > { %2172 = vmatpush3.bf16.msra.mxu1 %v2169_v34  ;;  %v2225_v34 = vpack.c.bf16 %v1000_v33, %v999_v31  ;;  %v1115_v31 = vld [vmem:[#allocation4 + $0x400] sm:$0xff] }
 0x330   : > { %2174 = vmatprep.subr.bf16.mxu1 %v2173_v37 }
 0x333   : > { %2176 = vmatpush3.bf16.msra.mxu1 %v2173_v37  ;;  %v2229_v37 = vpack.c.bf16 %v1002_v36, %v1001_v35  ;;  %v1118_v35 = vld [vmem:[#allocation4 + $0x418] sm:$0xff] }
 0x334   : > { %2178 = vmatprep.subr.bf16.mxu1 %v2177_v40 }
 0x337   : > { %2180 = vmatpush3.bf16.msra.mxu1 %v2177_v40  ;;  %v2233_v40 = vpack.c.bf16 %v1004_v39, %v1003_v38  ;;  %v1120_v38 = vld [vmem:[#allocation4 + $0x428] sm:$0xff] }
 0x338   : > { %2182 = vmatprep.subr.bf16.mxu1 %v2181_v43 }
 0x33b   : > { %2184 = vmatpush3.bf16.msra.mxu1 %v2181_v43 }
 0x33c   : > { %2186 = vmatprep.subr.bf16.mxu1 %v2185_v59 }
 0x33f   : > { %2188 = vmatpush3.bf16.msra.mxu1 %v2185_v59  ;;  %v2241_v59 = vpack.c.bf16 %v1008_v58, %v1007_v57 }
 0x340   : > { %2222 = vmatprep.subr.bf16.mxu1 %v2221_v32 }
 0x3f5   : > { %v1781_v45 = vpop.f32.mrb[4].mxu1 }
 0x3f6   : > { %v654_v46 = vadd.f32 %v1781_v45, %v1447_v44  ;;  %v648_v47 = vpop.f32.mrb[5].mxu1 }
 0x3f7   : > { %v649_v48 = vadd.f32 %v1447_v44, %v648_v47 }
 0x3f9   : > { %2404 = vtanh.f32 %v649_v48  ;;  %v1784_v49 = vpop.f32.mrb[6].mxu1 }
 0x3fa   : > { %2406 = vtanh.f32 %v654_v46  ;;  %v664_v50 = vadd.f32 %v1784_v49, %v1447_v44  ;;  %v658_v51 = vpop.f32.mrb[7].mxu1 }
 0x3fb   : > { %v659_v52 = vadd.f32 %v1447_v44, %v658_v51 }
 0x3fd   : > { %2408 = vtanh.f32 %v659_v52 }
 0x3fe   : > { %2410 = vtanh.f32 %v664_v50 }
 0x403   : > { %v2405_v53 = vpop.eup %2404 }
 0x404   : > { %v2407_v54 = vpop.eup %2406  ;;  %1817 = vmatprep.mubr.f32.mxu0 %v2405_v53 }
 0x405   : > { %1818 = vmatmul.mubr.f32.vlgmr.msra.gmra.mrb[8].mxu0 %v2407_v54  ;;  %v1005_v54 = vld [vmem:[#allocation4 + $0x380] sm:$0xff] }
 0x406   : > { %2192 = vmatpush3.bf16.msra.mxu0 %v2189_v63  ;;  %v1011_v63 = vld [vmem:[#allocation4 + $0x3b0] sm:$0xff] }
 0x407   : > { %v2409_v55 = vpop.eup %2408  ;;  %2194 = vmatprep.subr.bf16.mxu0 %v2193_v1 }
 0x408   : > { %v2411_v56 = vpop.eup %2410  ;;  %1820 = vmatprep.mubr.f32.mxu0 %v2409_v55  ;;  %v1006_v55 = vld [vmem:[#allocation4 + $0x388] sm:$0xff] }
 0x409   : > { %1821 = vmatmul.mubr.f32.gmra.mrb[10].mxu0 %v2411_v56  ;;  %v2237_v56 = vpack.c.bf16 %v1006_v55, %v1005_v54  ;;  %v1451_v55 = vld [vmem:[#allocation6 + $0x7] ss:$0 sm:$0xff] }
 0x40a   : > { %2196 = vmatpush3.bf16.msra.mxu0 %v2193_v1  ;;  %v2249_v1 = vpack.c.bf16 %v1012_v0, %v1011_v63 }
 0x40b   : > { %2198 = vmatprep.subr.bf16.mxu0 %v2197_v4 }
 0x40e   : > { %2200 = vmatpush3.bf16.msra.mxu0 %v2197_v4  ;;  %v1109_v4 = vld [vmem:[#allocation4 + $0x3d0] sm:$0xff] }
 0x40f   : > { %2202 = vmatprep.subr.bf16.mxu0 %v2201_v7 }
 0x412   : > { %2204 = vmatpush3.bf16.msra.mxu0 %v2201_v7  ;;  %v2257_v7 = vpack.c.bf16 %v1110_v6, %v1109_v4  ;;  %v1225_v4 = vld [vmem:[#allocation4 + $0x480] sm:$0xff] }
 0x413   : > { %2206 = vmatprep.subr.bf16.mxu0 %v2205_v19 }
 0x416   : > { %2208 = vmatpush3.bf16.msra.mxu0 %v2205_v19 }
 0x417   : > { %2210 = vmatprep.subr.bf16.mxu0 %v2209_v22 }
 0x41a   : > { %2212 = vmatpush3.bf16.msra.mxu0 %v2209_v22 }
 0x41b   : > { %2214 = vmatprep.subr.bf16.mxu0 %v2213_v25 }
 0x41e   : > { %2216 = vmatpush3.bf16.msra.mxu0 %v2213_v25 }
 0x41f   : > { %2218 = vmatprep.subr.bf16.mxu0 %v2217_v28 }
 0x422   : > { %2220 = vmatpush3.bf16.msra.mxu0 %v2217_v28 }
 0x423   : > { %2254 = vmatprep.subr.bf16.mxu0 %v2253_v5 }
 0x4d8   : > { %v1819_v9 = vpop.f32.mrb[8].mxu0 }
 0x4d9   : > { %v758_v10 = vpop.f32.mrb[9].mxu0  ;;  %v2777_v12 = vadd.f32 %v1819_v9, %v1448_v8  ;;  %v1112_v9 = vld [vmem:[#allocation4 + $0x3e8] sm:$0xff] }
 0x4da   : > { %v2775_v11 = vadd.f32 %v1448_v8, %v758_v10 }
 0x4dc   : > { %v1822_v13 = vpop.f32.mrb[10].mxu0  ;;  %1855 = vmatprep.mubr.f32.mxu1 %v2775_v11 }
 0x4dd   : > { %v768_v14 = vpop.f32.mrb[11].mxu0  ;;  %1856 = vmatmul.mubr.f32.vlgmr.msra.gmra.mrb[8].mxu1 %v2777_v12  ;;  %v2783_v16 = vadd.f32 %v1822_v13, %v1448_v8  ;;  %v1113_v13 = vld [vmem:[#allocation4 + $0x3f0] sm:$0xff] }
 0x4de   : > { %v2781_v15 = vadd.f32 %v1448_v8, %v768_v14  ;;  %2224 = vmatpush3.bf16.msra.mxu1 %v2221_v32  ;;  %v1111_v8 = vld [vmem:[#allocation4 + $0x3e0] sm:$0xff]  ;;  %v1114_v14 = vld [vmem:[#allocation4 + $0x3f8] sm:$0xff]  ;;  %v1116_v32 = vld [vmem:[#allocation4 + $0x408] sm:$0xff] }
 0x4df   : > { %2226 = vmatprep.subr.bf16.mxu1 %v2225_v34  ;;  %v2261_v10 = vpack.c.bf16 %v1112_v9, %v1111_v8  ;;  %v2265_v17 = vpack.c.bf16 %v1114_v14, %v1113_v13  ;;  %v2269_v33 = vpack.c.bf16 %v1116_v32, %v1115_v31  ;;  %v1228_v8 = vld [vmem:[#allocation4 + $0x498] sm:$0xff]  ;;  %v1230_v13 = vld [vmem:[#allocation4 + $0x4a8] sm:$0xff] }
 0x4e0   : > { %1858 = vmatprep.mubr.f32.mxu1 %v2781_v15 }
 0x4e1   : > { %1859 = vmatmul.mubr.f32.gmra.mrb[10].mxu1 %v2783_v16 }
 0x4e2   : > { %2228 = vmatpush3.bf16.msra.mxu1 %v2225_v34  ;;  %v1117_v34 = vld [vmem:[#allocation4 + $0x410] sm:$0xff] }
 0x4e3   : > { %2230 = vmatprep.subr.bf16.mxu1 %v2229_v37  ;;  %v2273_v36 = vpack.c.bf16 %v1118_v35, %v1117_v34 }
 0x4e6   : > { %2232 = vmatpush3.bf16.msra.mxu1 %v2229_v37  ;;  %v1119_v37 = vld [vmem:[#allocation4 + $0x420] sm:$0xff] }
 0x4e7   : > { %2234 = vmatprep.subr.bf16.mxu1 %v2233_v40  ;;  %v2277_v39 = vpack.c.bf16 %v1120_v38, %v1119_v37 }
 0x4ea   : > { %2236 = vmatpush3.bf16.msra.mxu1 %v2233_v40  ;;  %v1121_v40 = vld [vmem:[#allocation4 + $0x430] sm:$0xff] }
 0x4eb   : > { %2238 = vmatprep.subr.bf16.mxu1 %v2237_v56 }
 0x4ee   : > { %2240 = vmatpush3.bf16.msra.mxu1 %v2237_v56 }
 0x4ef   : > { %2242 = vmatprep.subr.bf16.mxu1 %v2241_v59 }
 0x4f2   : > { %2244 = vmatpush3.bf16.msra.mxu1 %v2241_v59 }
 0x4f3   : > { %2246 = vmatprep.subr.bf16.mxu1 %v2245_v62 }
 0x4f6   : > { %2248 = vmatpush3.bf16.msra.mxu1 %v2245_v62 }
 0x4f7   : > { %2250 = vmatprep.subr.bf16.mxu1 %v2249_v1 }
 0x4fa   : > { %2252 = vmatpush3.bf16.msra.mxu1 %v2249_v1 }
 0x5b0   : > { %v1857_v42 = vpop.f32.mrb[8].mxu1 }
 0x5b1   : > { %v870_v43 = vadd.f32 %v1857_v42, %v1449_v41  ;;  %v864_v44 = vpop.f32.mrb[9].mxu1 }
 0x5b2   : > { %v865_v45 = vadd.f32 %v1449_v41, %v864_v44  ;;  %v1218_v44 = vld [vmem:[#allocation4 + $0x448] sm:$0xff] }
 0x5b4   : > { %2412 = vtanh.f32 %v865_v45  ;;  %v1860_v46 = vpop.f32.mrb[10].mxu1  ;;  %v1219_v45 = vld [vmem:[#allocation4 + $0x450] sm:$0xff] }
 0x5b5   : > { %2414 = vtanh.f32 %v870_v43  ;;  %v880_v47 = vadd.f32 %v1860_v46, %v1449_v41  ;;  %v874_v48 = vpop.f32.mrb[11].mxu1  ;;  %v1217_v43 = vld [vmem:[#allocation4 + $0x440] sm:$0xff] }
 0x5b6   : > { %v875_v49 = vadd.f32 %v1449_v41, %v874_v48  ;;  %v1122_v41 = vld [vmem:[#allocation4 + $0x438] sm:$0xff]  ;;  %v2285_v46 = vpack.c.bf16 %v1218_v44, %v1217_v43 }
 0x5b7   : > { %v2281_v42 = vpack.c.bf16 %v1122_v41, %v1121_v40 }
 0x5b8   : > { %2416 = vtanh.f32 %v875_v49  ;;  %v1221_v49 = vld [vmem:[#allocation4 + $0x460] sm:$0xff]  ;;  %2286 = vmatprep.subr.bf16.mxu1 %v2285_v46 }
 0x5b9   : > { %2418 = vtanh.f32 %v880_v47  ;;  %v1220_v47 = vld [vmem:[#allocation4 + $0x458] sm:$0xff] }
 0x5ba   : > { %v2289_v48 = vpack.c.bf16 %v1220_v47, %v1219_v45 }
 0x5be   : > { %v2413_v50 = vpop.eup %2412 }
 0x5bf   : > { %v2415_v51 = vpop.eup %2414  ;;  %1893 = vmatprep.mubr.f32.mxu0 %v2413_v50  ;;  %v1222_v50 = vld [vmem:[#allocation4 + $0x468] sm:$0xff] }
 0x5c0   : > { %1894 = vmatmul.mubr.f32.vlgmr.msra.gmra.mrb[12].mxu0 %v2415_v51  ;;  %v2293_v51 = vpack.c.bf16 %v1222_v50, %v1221_v49 }
 0x5c1   : > { %2256 = vmatpush3.bf16.msra.mxu0 %v2253_v5  ;;  %v1226_v5 = vld [vmem:[#allocation4 + $0x488] sm:$0xff] }
 0x5c2   : > { %v2417_v52 = vpop.eup %2416  ;;  %2258 = vmatprep.subr.bf16.mxu0 %v2257_v7  ;;  %v2301_v6 = vpack.c.bf16 %v1226_v5, %v1225_v4 }
 0x5c3   : > { %v2419_v53 = vpop.eup %2418  ;;  %1896 = vmatprep.mubr.f32.mxu0 %v2417_v52  ;;  %v1223_v52 = vld [vmem:[#allocation4 + $0x470] sm:$0xff] }
 0x5c4   : > { %1897 = vmatmul.mubr.f32.gmra.mrb[14].mxu0 %v2419_v53  ;;  %v1224_v53 = vld [vmem:[#allocation4 + $0x478] sm:$0xff] }
 0x5c5   : > { %2260 = vmatpush3.bf16.msra.mxu0 %v2257_v7  ;;  %v2297_v54 = vpack.c.bf16 %v1224_v53, %v1223_v52  ;;  %v1227_v7 = vld [vmem:[#allocation4 + $0x490] sm:$0xff] }
 0x5c6   : > { %2262 = vmatprep.subr.bf16.mxu0 %v2261_v10  ;;  %v2305_v9 = vpack.c.bf16 %v1228_v8, %v1227_v7 }
 0x5c9   : > { %2264 = vmatpush3.bf16.msra.mxu0 %v2261_v10  ;;  %v1229_v10 = vld [vmem:[#allocation4 + $0x4a0] sm:$0xff] }
 0x5ca   : > { %2266 = vmatprep.subr.bf16.mxu0 %v2265_v17  ;;  %v2309_v14 = vpack.c.bf16 %v1230_v13, %v1229_v10 }
 0x5cd   : > { %2268 = vmatpush3.bf16.msra.mxu0 %v2265_v17  ;;  %v1231_v17 = vld [vmem:[#allocation4 + $0x4b0] sm:$0xff] }
 0x5ce   : > { %2270 = vmatprep.subr.bf16.mxu0 %v2269_v33 }
 0x5d1   : > { %2272 = vmatpush3.bf16.msra.mxu0 %v2269_v33  ;;  %v1453_v33 = vld [vmem:[#allocation6 + $0x9] ss:$0 sm:$0xff] }
 0x5d2   : > { %2274 = vmatprep.subr.bf16.mxu0 %v2273_v36 }
 0x5d5   : > { %2276 = vmatpush3.bf16.msra.mxu0 %v2273_v36 }
 0x5d6   : > { %2278 = vmatprep.subr.bf16.mxu0 %v2277_v39 }
 0x5d9   : > { %2280 = vmatpush3.bf16.msra.mxu0 %v2277_v39 }
 0x5da   : > { %2282 = vmatprep.subr.bf16.mxu0 %v2281_v42 }
 0x5dd   : > { %2284 = vmatpush3.bf16.msra.mxu0 %v2281_v42 }
 0x693   : > { %v1895_v19 = vpop.f32.mrb[12].mxu0 }
 0x694   : > { %v980_v20 = vadd.f32 %v1895_v19, %v1450_v18  ;;  %v974_v21 = vpop.f32.mrb[13].mxu0 }
 0x695   : > { %v975_v22 = vadd.f32 %v1450_v18, %v974_v21 }
 0x697   : > { %2420 = vtanh.f32 %v975_v22  ;;  %v1898_v23 = vpop.f32.mrb[14].mxu0 }
 0x698   : > { %2422 = vtanh.f32 %v980_v20  ;;  %v990_v24 = vadd.f32 %v1898_v23, %v1450_v18  ;;  %v984_v25 = vpop.f32.mrb[15].mxu0  ;;  %v1452_v20 = vld [vmem:[#allocation6 + $0x8] ss:$0 sm:$0xff] }
 0x699   : > { %v985_v26 = vadd.f32 %v1450_v18, %v984_v25  ;;  %v1232_v18 = vld [vmem:[#allocation4 + $0x4b8] sm:$0xff] }
 0x69a   : > { %v2313_v19 = vpack.c.bf16 %v1232_v18, %v1231_v17 }
 0x69b   : > { %2424 = vtanh.f32 %v985_v26 }
 0x69c   : > { %2426 = vtanh.f32 %v990_v24 }
 0x6a1   : > { %v2421_v27 = vpop.eup %2420 }
 0x6a2   : > { %v2423_v28 = vpop.eup %2422  ;;  %1931 = vmatprep.mubr.f32.mxu1 %v2421_v27 }
 0x6a3   : > { %1932 = vmatmul.mubr.f32.vlgmr.msra.gmra.mrb[12].mxu1 %v2423_v28 }
 0x6a4   : > { %2288 = vmatpush3.bf16.msra.mxu1 %v2285_v46 }
 0x6a5   : > { %v2425_v29 = vpop.eup %2424  ;;  %2290 = vmatprep.subr.bf16.mxu1 %v2289_v48 }
 0x6a6   : > { %v2427_v30 = vpop.eup %2426  ;;  %1934 = vmatprep.mubr.f32.mxu1 %v2425_v29 }
 0x6a7   : > { %1935 = vmatmul.mubr.f32.gmra.mrb[14].mxu1 %v2427_v30 }
 0x6a8   : > { %2292 = vmatpush3.bf16.msra.mxu1 %v2289_v48 }
 0x6a9   : > { %2294 = vmatprep.subr.bf16.mxu1 %v2293_v51 }
 0x6ac   : > { %2296 = vmatpush3.bf16.msra.mxu1 %v2293_v51 }
 0x6ad   : > { %2298 = vmatprep.subr.bf16.mxu1 %v2297_v54 }
 0x6b0   : > { %2300 = vmatpush3.bf16.msra.mxu1 %v2297_v54 }
 0x6b1   : > { %2302 = vmatprep.subr.bf16.mxu1 %v2301_v6 }
 0x6b4   : > { %2304 = vmatpush3.bf16.msra.mxu1 %v2301_v6 }
 0x6b5   : > { %2306 = vmatprep.subr.bf16.mxu1 %v2305_v9 }
 0x6b8   : > { %2308 = vmatpush3.bf16.msra.mxu1 %v2305_v9 }
 0x6b9   : > { %2310 = vmatprep.subr.bf16.mxu1 %v2309_v14 }
 0x6bc   : > { %2312 = vmatpush3.bf16.msra.mxu1 %v2309_v14 }
 0x6bd   : > { %2314 = vmatprep.subr.bf16.mxu1 %v2313_v19 }
 0x6c0   : > { %2316 = vmatpush3.bf16.msra.mxu1 %v2313_v19 }
 0x776   : > { %v1933_v56 = vpop.f32.mrb[12].mxu1 }
 0x777   : > { %v1090_v57 = vadd.f32 %v1933_v56, %v1451_v55  ;;  %v1084_v58 = vpop.f32.mrb[13].mxu1 }
 0x778   : > { %v1085_v59 = vadd.f32 %v1451_v55, %v1084_v58 }
 0x77a   : > { %2428 = vtanh.f32 %v1085_v59  ;;  %v1936_v60 = vpop.f32.mrb[14].mxu1 }
 0x77b   : > { %2430 = vtanh.f32 %v1090_v57  ;;  %v1100_v61 = vadd.f32 %v1936_v60, %v1451_v55  ;;  %v1094_v62 = vpop.f32.mrb[15].mxu1 }
 0x77c   : > { %v1095_v63 = vadd.f32 %v1451_v55, %v1094_v62 }
 0x77e   : > { %2432 = vtanh.f32 %v1095_v63 }
 0x77f   : > { %2434 = vtanh.f32 %v1100_v61 }
 0x784   : > { %v2429_v0 = vpop.eup %2428 }
 0x785   : > { %v2431_v1 = vpop.eup %2430  ;;  %1969 = vmatprep.mubr.f32.mxu0 %v2429_v0 }
 0x786   : > { %1970 = vmatmul.mubr.f32.vlgmr.msra.gmra.mrb[16].mxu0 %v2431_v1 }
 0x788   : > { %v2433_v2 = vpop.eup %2432 }
 0x789   : > { %v2435_v3 = vpop.eup %2434  ;;  %1972 = vmatprep.mubr.f32.mxu0 %v2433_v2 }
 0x78a   : > { %1973 = vmatmul.mubr.f32.gmra.mrb[18].mxu0 %v2435_v3 }
 0x859   : > { %v1971_v21 = vpop.f32.mrb[16].mxu0 }
 0x85a   : > { %v1200_v22 = vadd.f32 %v1971_v21, %v1452_v20  ;;  %v1194_v23 = vpop.f32.mrb[17].mxu0 }
 0x85b   : > { %v1195_v24 = vadd.f32 %v1452_v20, %v1194_v23 }
 0x85d   : > { %2436 = vtanh.f32 %v1195_v24  ;;  %v1974_v25 = vpop.f32.mrb[18].mxu0 }
 0x85e   : > { %2438 = vtanh.f32 %v1200_v22  ;;  %v1210_v26 = vadd.f32 %v1974_v25, %v1452_v20  ;;  %v1204_v27 = vpop.f32.mrb[19].mxu0 }
 0x85f   : > { %v1205_v28 = vadd.f32 %v1452_v20, %v1204_v27 }
 0x861   : > { %2440 = vtanh.f32 %v1205_v28 }
 0x862   : > { %2442 = vtanh.f32 %v1210_v26 }
 0x867   : > { %v2437_v29 = vpop.eup %2436 }
 0x868   : > { %v2439_v30 = vpop.eup %2438  ;;  %2007 = vmatprep.mubr.f32.mxu1 %v2437_v29 }
 0x869   : > { %2008 = vmatmul.mubr.f32.vlgmr.msra.gmra.mrb[16].mxu1 %v2439_v30 }
 0x86b   : > { %v2441_v31 = vpop.eup %2440 }
 0x86c   : > { %v2443_v32 = vpop.eup %2442  ;;  %2010 = vmatprep.mubr.f32.mxu1 %v2441_v31 }
 0x86d   : > { %2011 = vmatmul.mubr.f32.gmra.mrb[18].mxu1 %v2443_v32 }
 0x93c   : > { %v2009_v34 = vpop.f32.mrb[16].mxu1 }
 0x93d   : > { %v1304_v35 = vpop.f32.mrb[17].mxu1  ;;  %v1310_v39 = vadd.f32 %v2009_v34, %v1453_v33 }
 0x93e   : > { %v1305_v36 = vadd.f32 %v1453_v33, %v1304_v35 }
 0x940   : > { %v2012_v37 = vpop.f32.mrb[18].mxu1  ;;  %1323 = vrot.lane.b32.xlu0 %v1305_v36, %s2575_s17 }
 0x941   : > { %v1314_v38 = vpop.f32.mrb[19].mxu1  ;;  %v1320_v41 = vadd.f32 %v2012_v37, %v1453_v33 }
 0x942   : > { %v1315_v40 = vadd.f32 %v1453_v33, %v1314_v38 }
 0x944   : > { %1327 = vrot.lane.b32.xlu1 %v1315_v40, %s2575_s17  ;;  %1325 = vrot.lane.b32.xlu0 %v1310_v39, %s2575_s17 }
 0x948   : > { %1329 = vrot.lane.b32.xlu1 %v1320_v41, %s2575_s17 }
 0x9b2   : > { %v1324_v42 = vpop.permute.xlu0 %1323 }
 0x9b3   : > { %v1331_v43 = vadd.f32 %v1324_v42, %v2775_v11 }
 0x9b5   : > { %1335 = vst [vmem:[%s220_s12] sm:$0xff] %v1331_v43 }
 0x9b6   : > { %v1328_v44 = vpop.permute.xlu1 %1327  ;;  %v1326_v45 = vpop.permute.xlu0 %1325 }
 0x9b7   : > { %v1333_v46 = vadd.f32 %v1328_v44, %v2781_v15  ;;  %v1332_v47 = vadd.f32 %v1326_v45, %v2777_v12 }
 0x9b9   : > { %1336 = vst [vmem:[%s220_s12 + $0x8] sm:$0xff] %v1332_v47  ;;  %1337 = vst [vmem:[%s220_s12 + $0x10] sm:$0xff] %v1333_v46 }
 0x9ba   : > { %v1330_v48 = vpop.permute.xlu1 %1329 }
 0x9bb   : > { %v1334_v49 = vadd.f32 %v1330_v48, %v2783_v16 }
 0x9bd   : > { %1338 = vst [vmem:[%s220_s12 + $0x18] sm:$0xff] %v1334_v49 }
 0x9be PF: > { %p14_p6 = scmp.ge.s32.totalorder %s2698_s29, 4   ;;  %s2825_s12 = smov %s2560_s13 }
 0x9bf   : > { %s2826_s13 = smov %s2564_s14  ;;  %s2827_s14 = smov %s2709_s5 }
 0x9c0   : > { %s2828_s15 = smov %s2698_s29  ;;  %16 = sbr.rel (!%p14_p6) target bundleno = 4 (0x4), region = 80 }
 0x9c7   :  { %1361 = vsyncpa [#allocation3], 1 }
 0x9c8   :  { %1363 = vsyncpa [#allocation3 + $0x1], 1 }
 0x9c9   :  { %1364 = vsyncpa [#allocation5], 1 }

</bundles_post_ra>
